<compile_context>
chip_gen: v6e
topology: v6e:2x2x1
jax: 0.10.0
libtpu: 0.0.40
codegen_flags: <defaults>
</compile_context>

<pallas_src>
import jax
import jax.numpy as jnp
import numpy as np
from jax.experimental import pallas as pl
from jax.experimental.pallas import tpu as pltpu


# ----------------------------------------------------------------------------- utils
def _round_up(v, m):
    return ((v + m - 1) // m) * m


def _tpu_config():
    """Per-generation VMEM budget + TensorCore count (best effort, safe fallbacks)."""
    vmem_phys = 128 * 1024 * 1024            # v5e / v6e physical VMEM
    num_tc = 1
    try:
        info = pltpu.get_tpu_info()
        vmem_phys = int(getattr(info, "vmem_capacity_bytes", vmem_phys))
        num_tc = int(getattr(info, "num_cores", num_tc))
    except Exception:
        pass
    if vmem_phys <= 64 * 1024 * 1024:        # v7x-class: 64 MiB per TC, 2 TCs / chip
        num_tc = max(num_tc, 2)
        vmem_limit = (vmem_phys * 3) // 4    # ~48 MiB
    else:                                    # v5e / v6e: 128 MiB, 1 TC
        vmem_limit = min((vmem_phys * 3) // 4, 100 * 1024 * 1024)
    return int(vmem_limit), int(num_tc)


def _choose_batch_block(B, T, F, S, E, H_pad, vmem_limit, num_tc,
                        itemsize=4, target_block_bytes=8 << 20):
    """TB = batches per grid step, sized by bytes (HBM-bound regime) and VMEM."""
    per_batch_io = T * F * itemsize                        # one copy of the x block
    # double-buffered input + output x blocks dominate; static rows are tiny
    per_batch_vmem = 4 * per_batch_io + 2 * S * itemsize
    weights_bytes = 2 * itemsize * (S * E + E * F + 2 * F * H_pad + E + H_pad + 4 * F)
    chunk_scratch = 640 * (H_pad + 4 * F) * 4              # bound on chunk temporaries
    budget = vmem_limit - weights_bytes - chunk_scratch - (4 << 20)
    budget = max(budget, per_batch_vmem)
    tb_cap = int(min(B,
                     max(1, budget // per_batch_vmem),
                     max(1, target_block_bytes // per_batch_io)))

    def largest_divisor(cap, pred):
        for t in range(cap, 0, -1):
            if B % t == 0 and pred(t):
                return t
        return None

    tb = largest_divisor(tb_cap, lambda t: True)
    if num_tc >= 2:
        # v7x: prefer an even number (>=2) of grid steps so both TensorCores stay
        # busy, but never shrink the block by more than 4x to achieve it.
        even = largest_divisor(tb_cap, lambda t: (B // t) >= 2 and (B // t) % 2 == 0)
        if even is not None and 4 * even >= tb:
            tb = even
    return tb


def _choose_chunk(TB, T, F, H_pad, itemsize=4, target_rows=512, max_chunk_bytes=4 << 20):
    """CB = batches per inner MLP/LayerNorm chunk (bounds the (rows, H) temporary)."""
    per_batch = T * (H_pad + 4 * F) * itemsize
    cb = max(1, min(TB,
                    max(1, target_rows // max(T, 1)),
                    max(1, max_chunk_bytes // max(per_batch, 1))))
    while TB % cb:
        cb -= 1
    return cb


# ----------------------------------------------------------------------------- kernel
def _make_kernel(TB, T, F, CB):
    num_chunks = TB // CB

    def kernel(x_ref, static_ref, w_sp_ref, b_sp_ref, w_gp_ref, b_gp_ref,
               w1_ref, b1_ref, w2_ref, b2_ref, gamma_ref, beta_ref, o_ref):
        # Small weights/biases: constant block index -> fetched once, resident.
        w_sp = w_sp_ref[...]
        b_sp = b_sp_ref[...]
        w_gp = w_gp_ref[...]
        b_gp = b_gp_ref[...]
        w1 = w1_ref[...]
        b1 = b1_ref[...]
        w2 = w2_ref[...]
        b2 = b2_ref[...]
        gamma = gamma_ref[...]
        beta = beta_ref[...]
        mm_dtype = w1.dtype          # bf16 if the wrapper cast the weights, else f32

        def chunk(c, carry):
            b0 = c * CB                                           # batch offset in block

            # --- static conditioning for this chunk of CB batches ------------------
            s = static_ref[c]                                     # (CB, S)
            emb = jnp.maximum(
                jnp.dot(s.astype(w_sp.dtype), w_sp,
                        preferred_element_type=jnp.float32) + b_sp, 0.0)   # (CB, E)
            gate = jax.nn.sigmoid(
                jnp.dot(emb.astype(w_gp.dtype), w_gp,
                        preferred_element_type=jnp.float32) + b_gp)        # (CB, F)

            # --- condition dynamic features; collapse rows (T % 8 == 0) ------------
            xb = x_ref[pl.ds(b0, CB), :, :]                       # (CB, T, F)
            xc = (xb * gate[:, None, :]).reshape(CB * T, F)       # f32

            # --- feature MLP: Linear -> ReLU -> Dropout(eval=id) -> Linear ---------
            h = jnp.maximum(
                jnp.dot(xc.astype(mm_dtype), w1,
                        preferred_element_type=jnp.float32) + b1, 0.0)     # (rows, Hp)
            mlp = jnp.dot(h.astype(mm_dtype), w2,
                          preferred_element_type=jnp.float32) + b2         # (rows, F)
            mixed = xc + mlp                                      # residual

            # --- LayerNorm over features (two-pass stats, PyTorch parity) ----------
            mean = jnp.mean(mixed, axis=-1, keepdims=True)
            cen = mixed - mean
            var = jnp.mean(cen * cen, axis=-1, keepdims=True)
            out = cen * jax.lax.rsqrt(var + 1e-5) * gamma + beta

            o_ref[pl.ds(b0, CB), :, :] = out.reshape(CB, T, F).astype(o_ref.dtype)
            return carry

        if num_chunks == 1:
            chunk(0, 0)                       # static offsets, no loop
        else:
            # A real loop (not unrolled) bounds the live range of the (rows, H)
            # temporaries so TB can grow toward the HBM roofline without spilling.
            jax.lax.fori_loop(0, num_chunks, chunk, 0)

    return kernel


# ----------------------------------------------------------------------------- wrapper
def conditional_feature_mixing(x, static, params, *, use_bf16_matmul=False):
    """Pallas forward of ConditionalFeatureMixing (eval mode: dropout = identity)."""
    B, T, F = x.shape
    S = static.shape[1]
    E = params["w_sp"].shape[1]
    H = params["w1"].shape[1]

    # ---- wrapper-side padding -------------------------------------------------
    # T -> multiple of 8: layout-free (CB,T,F)<->(CB*T,F) collapses; padded rows are
    # per-row independent under LayerNorm and sliced off below.
    T_pad = _round_up(T, 8)
    if T_pad != T:
        x = jnp.pad(x, ((0, 0), (0, T_pad - T), (0, 0)))
    # H -> multiple of 128 (lane-dense hidden dim); exact because the padded columns
    # of w1/b1 give relu(0)=0 hidden units which hit zero rows of w2.
    H_pad = _round_up(H, 128)
    w1, b1, w2 = params["w1"], params["b1"], params["w2"]
    if H_pad != H:
        w1 = jnp.pad(w1, ((0, 0), (0, H_pad - H)))
        b1 = jnp.pad(b1, (0, H_pad - H))
        w2 = jnp.pad(w2, ((0, H_pad - H), (0, 0)))
    # NOTE: F (lane dim of x / out) is intentionally NOT padded: that would inflate
    # HBM traffic of a memory-bound kernel; the large TB block compensates instead.

    # ---- per-generation tiling --------------------------------------------------
    vmem_limit, num_tc = _tpu_config()
    TB = _choose_batch_block(B, T_pad, F, S, E, H_pad, vmem_limit, num_tc)
    CB = _choose_chunk(TB, T_pad, F, H_pad)
    num_blocks = B // TB
    num_chunks = TB // CB

    # static regrouped as (B/CB, CB, S): the kernel picks chunk c of its block with a
    # plain leading-dim index (no sublane-dim dynamic slicing, no relayouts).
    static_r = static.reshape(B // CB, CB, S)

    w_sp, w_gp = params["w_sp"], params["w_gp"]
    if use_bf16_matmul:
        # MXU operands only; biases, gate-mul, residual and LayerNorm stay f32.
        w_sp, w_gp = w_sp.astype(jnp.bfloat16), w_gp.astype(jnp.bfloat16)
        w1, w2 = w1.astype(jnp.bfloat16), w2.astype(jnp.bfloat16)

    # 1-D params as (1, dim) so each is a plain full-extent 2-D resident tile.
    b_sp = params["b_sp"].reshape(1, E).astype(jnp.float32)
    b_gp = params["b_gp"].reshape(1, F).astype(jnp.float32)
    b1 = b1.reshape(1, H_pad).astype(jnp.float32)
    b2 = params["b2"].reshape(1, F).astype(jnp.float32)
    gamma = params["gamma"].reshape(1, F).astype(jnp.float32)
    beta = params["beta"].reshape(1, F).astype(jnp.float32)

    def resident(shape):
        return pl.BlockSpec(shape, lambda i: tuple(0 for _ in shape))

    itemsize = 4
    w_item = 2 if use_bf16_matmul else 4
    cost = pl.CostEstimate(
        flops=int(4 * B * T_pad * F * H_pad            # two MLP matmuls
                  + 2 * B * (S * E + E * F)            # static / gate projections
                  + 12 * B * T_pad * F),               # gate-mul, residual, LayerNorm
        transcendentals=int(B * F + B * T_pad),        # sigmoid, rsqrt
        bytes_accessed=int(itemsize * (2 * B * T_pad * F + B * S)
                           + w_item * (S * E + E * F + 2 * F * H_pad)
                           + itemsize * (E + H_pad + 4 * F)),
    )

    out = pl.pallas_call(
        _make_kernel(TB, T_pad, F, CB),
        out_shape=jax.ShapeDtypeStruct((B, T_pad, F), x.dtype),
        grid=(num_blocks,),
        in_specs=[
            pl.BlockSpec((TB, T_pad, F), lambda i: (i, 0, 0)),        # x block
            pl.BlockSpec((num_chunks, CB, S), lambda i: (i, 0, 0)),   # static (regrouped)
            resident(w_sp.shape),       # w_sp (S, E)
            resident((1, E)),           # b_sp
            resident(w_gp.shape),       # w_gp (E, F)
            resident((1, F)),           # b_gp
            resident(w1.shape),         # w1 (F, H_pad)
            resident((1, H_pad)),       # b1
            resident(w2.shape),         # w2 (H_pad, F)
            resident((1, F)),           # b2
            resident((1, F)),           # gamma
            resident((1, F)),           # beta
        ],
        out_specs=pl.BlockSpec((TB, T_pad, F), lambda i: (i, 0, 0)),
        compiler_params=pltpu.CompilerParams(
            dimension_semantics=("parallel",),          # megacore sharding on 2-TC chips
            vmem_limit_bytes=int(vmem_limit),
        ),
        cost_estimate=cost,
    )(x, static_r, w_sp, b_sp, w_gp, b_gp, w1, b1, w2, b2, gamma, beta)

    if T_pad != T:
        out = out[:, :T, :]
    return out


# ----------------------------------------------------------------------------- reference
def reference_forward(x, static, params):
    """Pure-JAX reference mirroring the PyTorch module (eval mode)."""
    emb = jax.nn.relu(static @ params["w_sp"] + params["b_sp"])
    gate = jax.nn.sigmoid(emb @ params["w_gp"] + params["b_gp"])
    x_cond = x * gate[:, None, :]
    h = jax.nn.relu(x_cond @ params["w1"] + params["b1"])
    mlp = h @ params["w2"] + params["b2"]
    mixed = x_cond + mlp
    mean = mixed.mean(-1, keepdims=True)
    var = ((mixed - mean) ** 2).mean(-1, keepdims=True)
    xhat = (mixed - mean) / jnp.sqrt(var + 1e-5)
    return xhat * params["gamma"] + params["beta"]


if __name__ == "__main__":
    # Small shapes consistent with the module's forward.
    B, T = 2, 8                 # batch, sequence length
    feature_dim = 16
    static_size = 4
    static_embedding_size = 8
    hidden_size = 32

    key = jax.random.PRNGKey(0)
    ks = jax.random.split(key, 10)

    x = jax.random.normal(ks[0], (B, T, feature_dim), dtype=jnp.float32)
    static = jax.random.normal(ks[1], (B, static_size), dtype=jnp.float32)

    def init_linear(kw, fan_in, fan_out):
        bound = 1.0 / np.sqrt(fan_in)
        kw1, kw2 = jax.random.split(kw)
        w = jax.random.uniform(kw1, (fan_in, fan_out), jnp.float32, -bound, bound)
        b = jax.random.uniform(kw2, (fan_out,), jnp.float32, -bound, bound)
        return w, b

    w_sp, b_sp = init_linear(ks[2], static_size, static_embedding_size)   # static_proj
    w_gp, b_gp = init_linear(ks[3], static_embedding_size, feature_dim)   # gate_proj
    w1, b1 = init_linear(ks[4], feature_dim, hidden_size)                 # feature_mlp 1
    w2, b2 = init_linear(ks[5], hidden_size, feature_dim)                 # feature_mlp 2
    gamma = jnp.ones((feature_dim,), jnp.float32)                         # LayerNorm w
    beta = jnp.zeros((feature_dim,), jnp.float32)                         # LayerNorm b

    params = dict(w_sp=w_sp, b_sp=b_sp, w_gp=w_gp, b_gp=b_gp,
                  w1=w1, b1=b1, w2=w2, b2=b2, gamma=gamma, beta=beta)

    # f32 path: must match the reference tightly.
    out = jax.block_until_ready(conditional_feature_mixing(x, static, params))
    ref = jax.block_until_ready(reference_forward(x, static, params))
    assert out.shape == (B, T, feature_dim)
    assert np.allclose(np.asarray(out), np.asarray(ref), atol=2e-5, rtol=2e-5)

    # bf16-MXU-operand path (production throughput option): just verify it runs.
    out_bf16 = jax.block_until_ready(
        conditional_feature_mixing(x, static, params, use_bf16_matmul=True))
    assert out_bf16.shape == (B, T, feature_dim)
    assert bool(jnp.all(jnp.isfinite(out_bf16)))

    print("KERNEL_OK")
</pallas_src>

<mosaic_0001>
module attributes {stable_mosaic.version = 11 : i64} {
  func.func @kernel(%arg0: i32, %arg1: memref<2x8x16xf32, #tpu.memory_space<vmem>>, %arg2: memref<1x2x4xf32, #tpu.memory_space<vmem>>, %arg3: memref<4x8xf32, #tpu.memory_space<vmem>>, %arg4: memref<1x8xf32, #tpu.memory_space<vmem>>, %arg5: memref<8x16xf32, #tpu.memory_space<vmem>>, %arg6: memref<1x16xf32, #tpu.memory_space<vmem>>, %arg7: memref<16x128xf32, #tpu.memory_space<vmem>>, %arg8: memref<1x128xf32, #tpu.memory_space<vmem>>, %arg9: memref<128x16xf32, #tpu.memory_space<vmem>>, %arg10: memref<1x16xf32, #tpu.memory_space<vmem>>, %arg11: memref<1x16xf32, #tpu.memory_space<vmem>>, %arg12: memref<1x16xf32, #tpu.memory_space<vmem>>, %arg13: memref<2x8x16xf32, #tpu.memory_space<vmem>>) attributes {dimension_semantics = [#tpu.dimension_semantics<parallel>], iteration_bounds = array<i64: 1>, scalar_prefetch = 0 : i64, scratch_operands = 0 : i64, tpu.core_type = #tpu.core_type<tc>, window_params = [{transform_indices = @transform_0, window_bounds = array<i64: 2, 8, 16>}, {transform_indices = @transform_1, window_bounds = array<i64: 1, 2, 4>}, {pipeline_mode = #tpu.pipeline_mode<synchronous>, transform_indices = @transform_2, window_bounds = array<i64: 4, 8>}, {pipeline_mode = #tpu.pipeline_mode<synchronous>, transform_indices = @transform_3, window_bounds = array<i64: 1, 8>}, {pipeline_mode = #tpu.pipeline_mode<synchronous>, transform_indices = @transform_4, window_bounds = array<i64: 8, 16>}, {pipeline_mode = #tpu.pipeline_mode<synchronous>, transform_indices = @transform_5, window_bounds = array<i64: 1, 16>}, {pipeline_mode = #tpu.pipeline_mode<synchronous>, transform_indices = @transform_6, window_bounds = array<i64: 16, 128>}, {pipeline_mode = #tpu.pipeline_mode<synchronous>, transform_indices = @transform_7, window_bounds = array<i64: 1, 128>}, {pipeline_mode = #tpu.pipeline_mode<synchronous>, transform_indices = @transform_8, window_bounds = array<i64: 128, 16>}, {pipeline_mode = #tpu.pipeline_mode<synchronous>, transform_indices = @transform_9, window_bounds = array<i64: 1, 16>}, {pipeline_mode = #tpu.pipeline_mode<synchronous>, transform_indices = @transform_10, window_bounds = array<i64: 1, 16>}, {pipeline_mode = #tpu.pipeline_mode<synchronous>, transform_indices = @transform_11, window_bounds = array<i64: 1, 16>}, {transform_indices = @transform_12, window_bounds = array<i64: 2, 8, 16>}]} {
    %c0 = arith.constant 0 : index
    %c0_0 = arith.constant 0 : index
    %0 = vector.load %arg3[%c0, %c0_0] : memref<4x8xf32, #tpu.memory_space<vmem>>, vector<4x8xf32>
    %c0_1 = arith.constant 0 : index
    %c0_2 = arith.constant 0 : index
    %1 = vector.load %arg4[%c0_1, %c0_2] : memref<1x8xf32, #tpu.memory_space<vmem>>, vector<1x8xf32>
    %c0_3 = arith.constant 0 : index
    %c0_4 = arith.constant 0 : index
    %2 = vector.load %arg5[%c0_3, %c0_4] : memref<8x16xf32, #tpu.memory_space<vmem>>, vector<8x16xf32>
    %c0_5 = arith.constant 0 : index
    %c0_6 = arith.constant 0 : index
    %3 = vector.load %arg6[%c0_5, %c0_6] : memref<1x16xf32, #tpu.memory_space<vmem>>, vector<1x16xf32>
    %c0_7 = arith.constant 0 : index
    %c0_8 = arith.constant 0 : index
    %4 = vector.load %arg7[%c0_7, %c0_8] : memref<16x128xf32, #tpu.memory_space<vmem>>, vector<16x128xf32>
    %c0_9 = arith.constant 0 : index
    %c0_10 = arith.constant 0 : index
    %5 = vector.load %arg8[%c0_9, %c0_10] : memref<1x128xf32, #tpu.memory_space<vmem>>, vector<1x128xf32>
    %c0_11 = arith.constant 0 : index
    %c0_12 = arith.constant 0 : index
    %6 = vector.load %arg9[%c0_11, %c0_12] : memref<128x16xf32, #tpu.memory_space<vmem>>, vector<128x16xf32>
    %c0_13 = arith.constant 0 : index
    %c0_14 = arith.constant 0 : index
    %7 = vector.load %arg10[%c0_13, %c0_14] : memref<1x16xf32, #tpu.memory_space<vmem>>, vector<1x16xf32>
    %c0_15 = arith.constant 0 : index
    %c0_16 = arith.constant 0 : index
    %8 = vector.load %arg11[%c0_15, %c0_16] : memref<1x16xf32, #tpu.memory_space<vmem>>, vector<1x16xf32>
    %c0_17 = arith.constant 0 : index
    %c0_18 = arith.constant 0 : index
    %9 = vector.load %arg12[%c0_17, %c0_18] : memref<1x16xf32, #tpu.memory_space<vmem>>, vector<1x16xf32>
    %c0_19 = arith.constant 0 : index
    %c0_20 = arith.constant 0 : index
    %c0_21 = arith.constant 0 : index
    %10 = vector.load %arg2[%c0_19, %c0_20, %c0_21] : memref<1x2x4xf32, #tpu.memory_space<vmem>>, vector<1x2x4xf32>
    %11 = vector.shape_cast %10 : vector<1x2x4xf32> to vector<2x4xf32>
    %cst = arith.constant dense<0.000000e+00> : vector<2x8xf32>
    %12 = tpu.matmul %11, %0, %cst {dimension_numbers = #tpu.dot_dimension_numbers<[1], [0], [0], [1], [0, 0, 1, 1], [], []>} : vector<2x4xf32>, vector<4x8xf32>, vector<2x8xf32> -> vector<2x8xf32>
    %13 = vector.broadcast %1 : vector<1x8xf32> to vector<2x8xf32>
    %14 = arith.addf %12, %13 : vector<2x8xf32>
    %cst_22 = arith.constant 0.000000e+00 : f32
    %15 = vector.broadcast %cst_22 : f32 to vector<2x8xf32>
    %16 = arith.maximumf %14, %15 : vector<2x8xf32>
    %cst_23 = arith.constant dense<0.000000e+00> : vector<2x16xf32>
    %17 = tpu.matmul %16, %2, %cst_23 {dimension_numbers = #tpu.dot_dimension_numbers<[1], [0], [0], [1], [0, 0, 1, 1], [], []>} : vector<2x8xf32>, vector<8x16xf32>, vector<2x16xf32> -> vector<2x16xf32>
    %18 = vector.broadcast %3 : vector<1x16xf32> to vector<2x16xf32>
    %19 = arith.addf %17, %18 : vector<2x16xf32>
    %20 = arith.negf %19 : vector<2x16xf32>
    %21 = math.exp %20 : vector<2x16xf32>
    %cst_24 = arith.constant 1.000000e+00 : f32
    %22 = vector.broadcast %cst_24 : f32 to vector<2x16xf32>
    %23 = arith.addf %22, %21 : vector<2x16xf32>
    %24 = arith.divf %22, %23 : vector<2x16xf32>
    %c0_25 = arith.constant 0 : index
    %c0_26 = arith.constant 0 : index
    %c0_27 = arith.constant 0 : index
    %25 = vector.load %arg1[%c0_25, %c0_26, %c0_27] : memref<2x8x16xf32, #tpu.memory_space<vmem>>, vector<2x8x16xf32>
    %26 = vector.shape_cast %24 : vector<2x16xf32> to vector<2x1x16xf32>
    %27 = vector.broadcast %26 : vector<2x1x16xf32> to vector<2x8x16xf32>
    %28 = arith.mulf %25, %27 : vector<2x8x16xf32>
    %29 = vector.shape_cast %28 : vector<2x8x16xf32> to vector<16x16xf32>
    %cst_28 = arith.constant dense<0.000000e+00> : vector<16x128xf32>
    %30 = tpu.matmul %29, %4, %cst_28 {dimension_numbers = #tpu.dot_dimension_numbers<[1], [0], [0], [1], [0, 0, 1, 1], [], []>} : vector<16x16xf32>, vector<16x128xf32>, vector<16x128xf32> -> vector<16x128xf32>
    %31 = vector.broadcast %5 : vector<1x128xf32> to vector<16x128xf32>
    %32 = arith.addf %30, %31 : vector<16x128xf32>
    %cst_29 = arith.constant 0.000000e+00 : f32
    %33 = vector.broadcast %cst_29 : f32 to vector<16x128xf32>
    %34 = arith.maximumf %32, %33 : vector<16x128xf32>
    %cst_30 = arith.constant dense<0.000000e+00> : vector<16x16xf32>
    %35 = tpu.matmul %34, %6, %cst_30 {dimension_numbers = #tpu.dot_dimension_numbers<[1], [0], [0], [1], [0, 0, 1, 1], [], []>} : vector<16x128xf32>, vector<128x16xf32>, vector<16x16xf32> -> vector<16x16xf32>
    %36 = vector.broadcast %7 : vector<1x16xf32> to vector<16x16xf32>
    %37 = arith.addf %35, %36 : vector<16x16xf32>
    %38 = arith.addf %29, %37 : vector<16x16xf32>
    %cst_31 = arith.constant dense<0.000000e+00> : vector<16xf32>
    %39 = vector.multi_reduction <add>, %38, %cst_31 [1] : vector<16x16xf32> to vector<16xf32>
    %40 = vector.shape_cast %39 : vector<16xf32> to vector<16x1xf32>
    %cst_32 = arith.constant 1.600000e+01 : f32
    %41 = vector.broadcast %cst_32 : f32 to vector<16x1xf32>
    %42 = arith.divf %40, %41 : vector<16x1xf32>
    %43 = vector.broadcast %42 : vector<16x1xf32> to vector<16x16xf32>
    %44 = arith.subf %38, %43 : vector<16x16xf32>
    %45 = arith.mulf %44, %44 : vector<16x16xf32>
    %cst_33 = arith.constant dense<0.000000e+00> : vector<16xf32>
    %46 = vector.multi_reduction <add>, %45, %cst_33 [1] : vector<16x16xf32> to vector<16xf32>
    %47 = vector.shape_cast %46 : vector<16xf32> to vector<16x1xf32>
    %cst_34 = arith.constant 1.600000e+01 : f32
    %48 = vector.broadcast %cst_34 : f32 to vector<16x1xf32>
    %49 = arith.divf %47, %48 : vector<16x1xf32>
    %cst_35 = arith.constant 9.99999974E-6 : f32
    %50 = vector.broadcast %cst_35 : f32 to vector<16x1xf32>
    %51 = arith.addf %49, %50 : vector<16x1xf32>
    %52 = math.rsqrt %51 : vector<16x1xf32>
    %53 = vector.broadcast %52 : vector<16x1xf32> to vector<16x16xf32>
    %54 = arith.mulf %44, %53 : vector<16x16xf32>
    %55 = vector.broadcast %8 : vector<1x16xf32> to vector<16x16xf32>
    %56 = arith.mulf %54, %55 : vector<16x16xf32>
    %57 = vector.broadcast %9 : vector<1x16xf32> to vector<16x16xf32>
    %58 = arith.addf %56, %57 : vector<16x16xf32>
    %59 = vector.shape_cast %58 : vector<16x16xf32> to vector<2x8x16xf32>
    %c0_36 = arith.constant 0 : index
    %c0_37 = arith.constant 0 : index
    %c0_38 = arith.constant 0 : index
    %60 = vector.load %arg13[%c0_36, %c0_37, %c0_38] : memref<2x8x16xf32, #tpu.memory_space<vmem>>, vector<2x8x16xf32>
    tpu.vector_store %arg13[%c0_36, %c0_37, %c0_38], %59 {strides = array<i32>} : memref<2x8x16xf32, #tpu.memory_space<vmem>>, vector<2x8x16xf32>,
    return
  }
  func.func @transform_0(%arg0: i32) -> (i32, i32, i32) {
    %c0_i32 = arith.constant 0 : i32
    %c0_i32_0 = arith.constant 0 : i32
    %c0_i32_1 = arith.constant 0 : i32
    return %arg0, %c0_i32, %c0_i32_0 : i32, i32, i32
  }
  func.func @transform_1(%arg0: i32) -> (i32, i32, i32) {
    %c0_i32 = arith.constant 0 : i32
    %c0_i32_0 = arith.constant 0 : i32
    %c0_i32_1 = arith.constant 0 : i32
    return %arg0, %c0_i32, %c0_i32_0 : i32, i32, i32
  }
  func.func @transform_2(%arg0: i32) -> (i32, i32) {
    %c0_i32 = arith.constant 0 : i32
    %c0_i32_0 = arith.constant 0 : i32
    %c0_i32_1 = arith.constant 0 : i32
    return %c0_i32, %c0_i32_0 : i32, i32
  }
  func.func @transform_3(%arg0: i32) -> (i32, i32) {
    %c0_i32 = arith.constant 0 : i32
    %c0_i32_0 = arith.constant 0 : i32
    %c0_i32_1 = arith.constant 0 : i32
    return %c0_i32, %c0_i32_0 : i32, i32
  }
  func.func @transform_4(%arg0: i32) -> (i32, i32) {
    %c0_i32 = arith.constant 0 : i32
    %c0_i32_0 = arith.constant 0 : i32
    %c0_i32_1 = arith.constant 0 : i32
    return %c0_i32, %c0_i32_0 : i32, i32
  }
  func.func @transform_5(%arg0: i32) -> (i32, i32) {
    %c0_i32 = arith.constant 0 : i32
    %c0_i32_0 = arith.constant 0 : i32
    %c0_i32_1 = arith.constant 0 : i32
    return %c0_i32, %c0_i32_0 : i32, i32
  }
  func.func @transform_6(%arg0: i32) -> (i32, i32) {
    %c0_i32 = arith.constant 0 : i32
    %c0_i32_0 = arith.constant 0 : i32
    %c0_i32_1 = arith.constant 0 : i32
    return %c0_i32, %c0_i32_0 : i32, i32
  }
  func.func @transform_7(%arg0: i32) -> (i32, i32) {
    %c0_i32 = arith.constant 0 : i32
    %c0_i32_0 = arith.constant 0 : i32
    %c0_i32_1 = arith.constant 0 : i32
    return %c0_i32, %c0_i32_0 : i32, i32
  }
  func.func @transform_8(%arg0: i32) -> (i32, i32) {
    %c0_i32 = arith.constant 0 : i32
    %c0_i32_0 = arith.constant 0 : i32
    %c0_i32_1 = arith.constant 0 : i32
    return %c0_i32, %c0_i32_0 : i32, i32
  }
  func.func @transform_9(%arg0: i32) -> (i32, i32) {
    %c0_i32 = arith.constant 0 : i32
    %c0_i32_0 = arith.constant 0 : i32
    %c0_i32_1 = arith.constant 0 : i32
    return %c0_i32, %c0_i32_0 : i32, i32
  }
  func.func @transform_10(%arg0: i32) -> (i32, i32) {
    %c0_i32 = arith.constant 0 : i32
    %c0_i32_0 = arith.constant 0 : i32
    %c0_i32_1 = arith.constant 0 : i32
    return %c0_i32, %c0_i32_0 : i32, i32
  }
  func.func @transform_11(%arg0: i32) -> (i32, i32) {
    %c0_i32 = arith.constant 0 : i32
    %c0_i32_0 = arith.constant 0 : i32
    %c0_i32_1 = arith.constant 0 : i32
    return %c0_i32, %c0_i32_0 : i32, i32
  }
  func.func @transform_12(%arg0: i32) -> (i32, i32, i32) {
    %c0_i32 = arith.constant 0 : i32
    %c0_i32_0 = arith.constant 0 : i32
    %c0_i32_1 = arith.constant 0 : i32
    return %arg0, %c0_i32, %c0_i32_0 : i32, i32, i32
  }
}

</mosaic_0001>

<bundles_post_ra>
// kernel: tpu_custom_call.1
= control target key start
LH: loop header
LB: loop body
LE: loop exit
PB: predicated region body
PF: predicated region fallthrough
CT: control target
= control target key end

     0   :  { %vm79_vm0 = vcmask 1043456   ;;  %vm75_vm1 = vcmask 31744   ;;  %v637_v1 = vmov 0.0   ;;  %vm638_vm2 = vmmov 0   ;;  %s806_s0 = inlined_call_operand.vmem [shape: f32[2,8,16], index: 0, kind: input, shape index: {}]   ;;  %s807_s1 = inlined_call_operand.vmem [shape: f32[1,2,4], index: 1, kind: input, shape index: {}]   ;;  %s808_s2 = inlined_call_operand.vmem [shape: f32[4,8], index: 2, kind: input, shape index: {}]   ;;  %s809_s3 = inlined_call_operand.vmem [shape: f32[1,8], index: 3, kind: input, shape index: {}]   ;;  %s810_s4 = inlined_call_operand.vmem [shape: f32[8,16], index: 4, kind: input, shape index: {}]   ;;  %s811_s5 = inlined_call_operand.vmem [shape: f32[1,16], index: 5, kind: input, shape index: {}]   ;;  %s812_s6 = inlined_call_operand.vmem [shape: f32[16,128], index: 6, kind: input, shape index: {}]   ;;  %s813_s7 = inlined_call_operand.vmem [shape: f32[1,128], index: 7, kind: input, shape index: {}]   ;;  %s814_s8 = inlined_call_operand.vmem [shape: f32[128,16], index: 8, kind: input, shape index: {}]   ;;  %s815_s9 = inlined_call_operand.vmem [shape: f32[1,16], index: 9, kind: input, shape index: {}]   ;;  %s816_s10 = inlined_call_operand.vmem [shape: f32[1,16], index: 10, kind: input, shape index: {}]   ;;  %s817_s11 = inlined_call_operand.vmem [shape: f32[1,16], index: 11, kind: input, shape index: {}]   ;;  %s818_s12 = inlined_call_operand.hbm [shape: f32[2,8,16], index: 12, kind: output, shape index: {}]  }
   0x1   :  { %v42_v0 = vld [vmem:[%s808_s2] sm:$0xf]  ;;  %549 = vmatprep.subr.mxu0 %v637_v1  ;;  %551 = vmatprep.mubr.msk.f32.mxu0 %vm638_vm2, %v637_v1 }
   0x2   :  { %v68_v2 = vld [vmem:[%s807_s1] sm:$0x3] }
   0x3   :  { %17 = vsyncpa [#allocation3], 0  ;;  %550 = vmatpush3.msk.msra.mxu0 %vm79_vm0, %v42_v0  ;;  %v44_v3 = vld [vmem:[%s810_s4] sm:$0xff]  ;;  %vm160_vm3 = vcmask 64512   ;;  %v47_v9 = vld [vmem:[%s812_s6 + $0x8] sm:$0xff]  ;;  %v246_v32 = vlaneseq  ;;  %vm283_vm4 = vcmask 130048  }
   0x4   :  { %552 = vmatmul.mubr.msk.f32.vlgmr.msra.gmra.mxu0 %vm75_vm1, %v68_v2  ;;  %554 = vmatprep.subr.mxu0 %v637_v1  ;;  %v511_v4 = vld [vmem:[%s809_s3] ss:$0 sm:$0xff]  ;;  %v64_v11 = vld [vmem:[%s814_s8 + $0x78] sm:$0xff]  ;;  %v63_v12 = vld [vmem:[%s814_s8 + $0x70] sm:$0xff]  ;;  %v639_v30 = vmov 1966171168  }
   0x5   :  { %556 = vmatprep.mubr.msk.f32.mxu0 %vm638_vm2, %v637_v1  ;;  %555 = vmatpush3.msra.mxu0 %v44_v3  ;;  %v46_v10 = vld [vmem:[%s812_s6] sm:$0xff]  ;;  %v62_v13 = vld [vmem:[%s814_s8 + $0x68] sm:$0xff]  ;;  %v60_v15 = vld [vmem:[%s814_s8 + $0x58] sm:$0xff]  ;;  %v244_v31 = vunpack.c.l.s4 %v639_v30  ;;  %v247_v34 = vshrl.u32 %v246_v32, 7  ;;  %s640_s27 = smov [#allocation2]  }
   0x6   :  { %559 = vmatprep.subr.mxu0 %v47_v9  ;;  %566 = vmatprep.subr.mxu1 %v64_v11  ;;  %v61_v14 = vld [vmem:[%s814_s8 + $0x60] sm:$0xff]  ;;  %v59_v16 = vld [vmem:[%s814_s8 + $0x50] sm:$0xff]  ;;  %v58_v17 = vld [vmem:[%s814_s8 + $0x48] sm:$0xff]  ;;  %s500_s1 = sshll.u32 %s640_s27, 4  ;;  %s501_s1 = int_to_ptr.vmem [resolvable:$true] %s500_s1 }
   0x7   :  { %567 = vmatpush3.msra.mxu1 %v64_v11  ;;  %v57_v18 = vld [vmem:[%s814_s8 + $0x40] sm:$0xff]  ;;  %v56_v19 = vld [vmem:[%s814_s8 + $0x38] sm:$0xff]  ;;  %v55_v20 = vld [vmem:[%s814_s8 + $0x30] sm:$0xff]  ;;  %v245_v33 = vunpack.c.0.s8 %v244_v31  ;;  %v267_v38 = vsub.s32 0, %v247_v34  ;;  %s615_s28 = scalar_lea.vmem %s501_s1, 256  ;;  %p620_p1 = scmp.lt.s32.totalorder %s501_s1, %s501_s1 }
   0x8   :  { %568 = vmatprep.subr.mxu1 %v63_v12  ;;  %v54_v21 = vld [vmem:[%s814_s8 + $0x28] sm:$0xff]  ;;  %v53_v22 = vld [vmem:[%s814_s8 + $0x20] sm:$0xff]  ;;  %v52_v48 = vld [vmem:[%s814_s8 + $0x18] sm:$0xff]  ;;  %p616_p0 = scmp.ne.s32.totalorder %s501_s1, %s615_s28  ;;  %p621_p2 = scmp.lt.s32.totalorder %s615_s28, %s615_s28 }
   0x9   :  { %569 = vmatpush3.msra.mxu1 %v63_v12  ;;  %v514_v23 = vld [vmem:[%s811_s5] ss:$0 sm:$0xff]  ;;  %v248_v35 = vsub.s32 %v245_v33, %v247_v34  ;;  %v241_v44 = vld [vmem:[%s806_s0 + $0x8] sm:$0xff]  ;;  %v51_v49 = vld [vmem:[%s814_s8 + $0x10] sm:$0xff] }
   0xa   :  { %570 = vmatprep.subr.mxu1 %v62_v13  ;;  %v240_v41 = vld [vmem:[%s806_s0] sm:$0xff]  ;;  %v50_v50 = vld [vmem:[%s814_s8 + $0x8] sm:$0xff]  ;;  %p622_p3 = por %p621_p2, %p620_p1 }
   0xb   :  { %571 = vmatpush3.msra.mxu1 %v62_v13  ;;  %v49_v51 = vld [vmem:[%s814_s8] sm:$0xff] }
   0xc   :  { %572 = vmatprep.subr.mxu1 %v61_v14  ;;  %v517_v52 = vld [vmem:[%s813_s7] ss:$0 sm:$0xff]  ;;  %p623_p4 = pnand %p622_p3, %p616_p0 }
   0xd   :  { %573 = vmatpush3.msra.mxu1 %v61_v14  ;;  %v520_v60 = vld [vmem:[%s815_s9] ss:$0 sm:$0xff] }
   0xe   :  { %574 = vmatprep.subr.mxu1 %v60_v15 }
   0xf   :  { %575 = vmatpush3.msra.mxu1 %v60_v15 }
  0x10   :  { %576 = vmatprep.subr.mxu1 %v59_v16 }
  0x11   :  { %577 = vmatpush3.msra.mxu1 %v59_v16 }
  0x12   :  { %578 = vmatprep.subr.mxu1 %v58_v17 }
  0x13   :  { %579 = vmatpush3.msra.mxu1 %v58_v17 }
  0x14   :  { %580 = vmatprep.subr.mxu1 %v57_v18 }
  0x15   :  { %581 = vmatpush3.msra.mxu1 %v57_v18 }
  0x16   :  { %582 = vmatprep.subr.mxu1 %v56_v19 }
  0x17   :  { %583 = vmatpush3.msra.mxu1 %v56_v19 }
  0x18   :  { %584 = vmatprep.subr.mxu1 %v55_v20 }
  0x19   :  { %585 = vmatpush3.msra.mxu1 %v55_v20 }
  0x1a   :  { %586 = vmatprep.subr.mxu1 %v54_v21 }
  0x1b   :  { %587 = vmatpush3.msra.mxu1 %v54_v21  ;;  %v521_v21 = vld [vmem:[%s816_s10] ss:$0 sm:$0xff] }
  0x1c   :  { %588 = vmatprep.subr.mxu1 %v53_v22 }
  0x1d   :  { %589 = vmatpush3.msra.mxu1 %v53_v22 }
  0x1e   :  { %590 = vmatprep.subr.mxu1 %v52_v48 }
  0x1f   :  { %591 = vmatpush3.msra.mxu1 %v52_v48 }
  0x20   :  { %592 = vmatprep.subr.mxu1 %v51_v49 }
  0x21   :  { %593 = vmatpush3.msra.mxu1 %v51_v49 }
  0x22   :  { %594 = vmatprep.subr.mxu1 %v50_v50 }
  0x23   :  { %595 = vmatpush3.msra.mxu1 %v50_v50 }
  0x24   :  { %596 = vmatprep.subr.mxu1 %v49_v51 }
  0x25   :  { %597 = vmatpush3.msra.mxu1 %v49_v51 }
  0xc4   :  { %v149_v5 = vpop.f32.mrf.mxu0 }
  0xc5   :  { %v150_v6 = vadd.f32 %v511_v4, %v149_v5 }
  0xc6   :  { %v553_v7 = vpop.f32.mrf.mxu0 }
  0xc7   :  { %v153_v8 = vmax.f32 %v150_v6, 0.0 }
  0xc9   :  { %557 = vmatmul.mubr.msk.f32.vlgmr.msra.gmra.mxu0 %vm160_vm3, %v153_v8 }
  0xca   :  { %560 = vmatpush3.msra.mxu0 %v47_v9 }
  0xcb   :  { %561 = vmatprep.subr.mxu0 %v46_v10 }
  0xcc   :  { %562 = vmatpush3.msra.mxu0 %v46_v10 }
 0x189   :  { %v230_v24 = vpop.f32.mrf.mxu0 }
 0x18a   :  { %v231_v25 = vadd.f32 %v514_v23, %v230_v24  ;;  %v522_v23 = vld [vmem:[%s817_s11] ss:$0 sm:$0xff] }
 0x18b   :  { %v558_v26 = vpop.f32.mrf.mxu0 }
 0x18c   :  { %v516_v27 = vmul.f32 -1.442695, %v231_v25 }
 0x18e   :  { %607 = vpow2.f32 %v516_v27 }
 0x19b   :  { %v608_v28 = vpop.eup %607 }
 0x19c   :  { %v237_v29 = vadd.f32 1.0, %v608_v28 }
 0x19e   :  { %609 = vrcp.f32 %v237_v29 }
 0x1ab   :  { %v610_v36 = vpop.eup %609 }
 0x1ac   :  { %v249_v37 = vrot.slane %v610_v36, %v248_v35 }
 0x1ae   :  { %v250_v39 = vcombine.high %v249_v37, %v249_v37  ;;  %v257_v40 = vrot.slane %v249_v37, %v248_v35 }
 0x1b0   :  { %v264_v42 = vrot.slane %v250_v39, %v248_v35  ;;  %v268_v43 = vrot.slane %v257_v40, %v267_v38 }
 0x1b2   :  { %v272_v45 = vrot.slane %v264_v42, %v267_v38  ;;  %v275_v46 = vmul.f32 %v268_v43, %v240_v41 }
 0x1b4   :  { %563 = vmatprep.mubr.msk.f32.mxu0 %vm283_vm4, %v275_v46  ;;  %v276_v47 = vmul.f32 %v272_v45, %v241_v44 }
 0x1b6   :  { %564 = vmatmul.mubr.msk.f32.vlgmr.msra.gmra.mxu0 %vm283_vm4, %v276_v47 }
 0x276   :  { %v565_v53 = vpop.f32.mrf.mxu0 }
 0x277   :  { %v362_v54 = vadd.f32 %v565_v53, %v517_v52 }
 0x278   :  { %v356_v55 = vpop.f32.mrf.mxu0 }
 0x279   :  { %v357_v56 = vadd.f32 %v517_v52, %v356_v55  ;;  %v366_v58 = vmax.f32 %v362_v54, 0.0 }
 0x27b   :  { %v365_v57 = vmax.f32 %v357_v56, 0.0 }
 0x27d   :  { %598 = vmatprep.mubr.f32.mxu1 %v365_v57 }
 0x27e   :  { %599 = vmatmul.mubr.f32.vlgmr.msra.gmra.mxu1 %v366_v58 }
 0x33e   :  { %v600_v59 = vpop.f32.mrf.mxu1 }
 0x33f   :  { %v445_v62 = vadd.f32 %v600_v59, %v520_v60 }
 0x340   :  { %v439_v61 = vpop.f32.mrf.mxu1 }
 0x341   :  { %v440_v63 = vadd.f32 %v520_v60, %v439_v61  ;;  %v449_v2 = vadd.f32 %v445_v62, %v276_v47 }
 0x343   :  { %v448_v0 = vadd.f32 %v440_v63, %v275_v46  ;;  %v453_v3 = vsel %vm283_vm4, %v449_v2, 0.0 }
 0x345   :  { %v450_v1 = vsel %vm283_vm4, %v448_v0, 0.0 }
 0x346   :  { %451 = vadd.xlane.f32.xlu0 %v450_v1 }
 0x34a   :  { %454 = vadd.xlane.f32.xlu0 %v453_v3 }
 0x3cf   :  { %v452_v4 = vpop.xlane.xlu0 %451 }
 0x3d0   :  { %v457_v5 = vmul.f32 0.0625, %v452_v4 }
 0x3d2   :  { %v459_v6 = vsub.f32 %v448_v0, %v457_v5 }
 0x3d3   :  { %v455_v7 = vpop.xlane.xlu0 %454 }
 0x3d4   :  { %v458_v8 = vmul.f32 0.0625, %v455_v7  ;;  %v461_v9 = vmul.f32 %v459_v6, %v459_v6 }
 0x3d6   :  { %v460_v10 = vsub.f32 %v449_v2, %v458_v8  ;;  %v463_v11 = vsel %vm283_vm4, %v461_v9, 0.0 }
 0x3d7   :  { %464 = vadd.xlane.f32.xlu1 %v463_v11 }
 0x3d8   :  { %v462_v12 = vmul.f32 %v460_v10, %v460_v10 }
 0x3da   :  { %v466_v13 = vsel %vm283_vm4, %v462_v12, 0.0 }
 0x3db   :  { %467 = vadd.xlane.f32.xlu1 %v466_v13 }
 0x460   :  { %v465_v14 = vpop.xlane.xlu1 %464 }
 0x461   :  { %v469_v15 = vmul.f32 0.0625, %v465_v14 }
 0x463   :  { %v471_v16 = vadd.f32 1e-05, %v469_v15 }
 0x464   :  { %v468_v17 = vpop.xlane.xlu1 %467 }
 0x465   :  { %611 = vrsqrt.f32 %v471_v16  ;;  %v470_v18 = vmul.f32 0.0625, %v468_v17 }
 0x467   :  { %v472_v19 = vadd.f32 1e-05, %v470_v18 }
 0x469   :  { %613 = vrsqrt.f32 %v472_v19 }
 0x472   :  { %v612_v20 = vpop.eup %611 }
 0x473   :  { %v475_v22 = vmul.f32 %v612_v20, %v459_v6 }
 0x475   :  { %v483_v24 = vmul.f32 %v521_v21, %v475_v22 }
 0x476   :  { %v614_v25 = vpop.eup %613 }
 0x477   :  { %v476_v26 = vmul.f32 %v614_v25, %v460_v10  ;;  %v491_v27 = vadd.f32 %v522_v23, %v483_v24 }
 0x479   :  { %v484_v28 = vmul.f32 %v521_v21, %v476_v26  ;;  %493 = vst.msk [vmem:[#allocation2] sm:$0xff] %vm283_vm4, %v491_v27 }
 0x47b   :  { %v492_v29 = vadd.f32 %v522_v23, %v484_v28 }
 0x47d   :  { %494 = vst.msk [vmem:[#allocation2 + $0x8] sm:$0xff] %vm283_vm4, %v492_v29 }
 0x47e   :  { %626 = shalt.err (!%p623_p4)
}
 0x47f   :  { %s641_s10 = smov 128   ;;  %s642_s11 = smov 8  }
 0x480   :  { %506 = dma.vmem_to_hbm [thread:$0]  %s501_s1, 256, %s818_s12, [#allocation3], %s641_s10, %s641_s10, %s642_s11  }
 0x481   :  { %635 = dma.done.wait [#allocation3], 256  }
 0x482   :  { %636 = vsyncadd [#allocation3], 4294967040 }
 0x483   :  { %510 = vsyncpa [#allocation3], 1 }

</bundles_post_ra>
